<compile_context>
chip_gen: v5e
topology: v5e:2x2
jax: 0.10.0
libtpu: 0.0.40
codegen_flags: <defaults>
</compile_context>

<pallas_src>
import jax
import jax.numpy as jnp
from jax.experimental import pallas as pl
from jax.experimental.pallas import tpu as pltpu

_LANE = 128
_SUBLANE = 8
_SMALL_INPUT_THRESHOLD = 1 << 20  # elements; below this, plain XLA wins.


def _relu_kernel(x_ref, o_ref):
    # Elementwise ReLU on one (tile_rows, 128) f32 tile of the real plane.
    x = x_ref[...]
    o_ref[...] = jnp.maximum(x, 0.0)


def _round_up(n: int, m: int) -> int:
    return (n + m - 1) // m * m


def _pick_tile_rows(rows: int, tile_rows: int) -> int:
    """Pick a sublane-aligned row tile, forcing >=2 grid blocks when possible."""
    if rows <= _SUBLANE:
        return _SUBLANE
    # Cap at ~half the rows so the 'parallel' axis has >=2 blocks (v7x megacore).
    half = _round_up(pl.cdiv(rows, 2), _SUBLANE)
    t = min(tile_rows, half)
    return max(t, _SUBLANE)


def _relu_pallas(re2d: jax.Array, rows: int, t: int, numel: int) -> jax.Array:
    grid = (pl.cdiv(rows, t),)
    spec = pl.BlockSpec((t, _LANE), lambda i: (i, 0))
    return pl.pallas_call(
        _relu_kernel,
        out_shape=jax.ShapeDtypeStruct((rows, _LANE), jnp.float32),
        grid_spec=pltpu.PrefetchScalarGridSpec(
            num_scalar_prefetch=0,
            grid=grid,
            in_specs=[spec],
            out_specs=spec,
        ),
        compiler_params=pltpu.CompilerParams(
            dimension_semantics=("parallel",),
            # Let XLA fuse the real-extract/reshape producer into the input DMA
            # instead of materializing the f32 real plane in HBM.
            allow_input_fusion=[True],
        ),
        cost_estimate=pl.CostEstimate(
            flops=rows * _LANE,
            transcendentals=0,
            # fused complex read (8 B/elem) + f32 output write (4 B/elem)
            bytes_accessed=numel * 8 + rows * _LANE * 4,
        ),
    )(re2d)


def complex_relu(x: jax.Array, *, tile_rows: int = 2048,
                 force_pallas: bool = False) -> jax.Array:
    """ComplexReLU: ReLU on the real part, imaginary part unchanged."""
    assert x.dtype == jnp.complex64, "expected complex64 input"
    numel = x.size
    if numel == 0:
        return x

    re = jnp.real(x)
    im = jnp.imag(x)

    # Small-input fast path: launch + per-step overhead dominates; plain XLA
    # fuses this into a single pass.
    if not force_pallas and numel < _SMALL_INPUT_THRESHOLD:
        return jax.lax.complex(jnp.maximum(re, 0.0), im)

    # Flatten and pad the real plane to a multiple of (8 * 128) so the (8,128)
    # block constraint holds exactly and rows is always sublane-aligned.
    flat = re.reshape(-1)
    padded = _round_up(numel, _SUBLANE * _LANE)
    if padded != numel:
        flat = jnp.pad(flat, (0, padded - numel))
    rows = padded // _LANE
    re2d = flat.reshape(rows, _LANE)

    t = _pick_tile_rows(rows, tile_rows)
    re_out = _relu_pallas(re2d, rows, t, numel)

    re_new = re_out.reshape(-1)
    if padded != numel:
        re_new = re_new[:numel]
    re_new = re_new.reshape(x.shape)

    # Imag pass-through fuses with the complex join outside the kernel.
    return jax.lax.complex(re_new, im)


def _check(x_re, x_im, y):
    y_ref = jax.lax.complex(jnp.maximum(x_re, 0.0), x_im)
    assert y.shape == x_re.shape and y.dtype == jnp.complex64
    assert jnp.allclose(jnp.real(y), jnp.real(y_ref))
    assert jnp.allclose(jnp.imag(y), jnp.imag(y_ref))


if __name__ == "__main__":
    key = jax.random.PRNGKey(0)

    # --- Main demo: NCHW (2, 4, 16, 16), Pallas path forced so the kernel runs.
    # numel = 2048 -> rows = 16, tile = 8 -> 2 grid blocks (exercises megacore split).
    k_re, k_im, key = jax.random.split(key, 3)
    shape = (2, 4, 16, 16)
    x_re = jax.random.normal(k_re, shape, dtype=jnp.float32)
    x_im = jax.random.normal(k_im, shape, dtype=jnp.float32)
    x = jax.lax.complex(x_re, x_im)

    y = jax.block_until_ready(complex_relu(x, force_pallas=True))
    _check(x_re, x_im, y)

    # Default dispatch (small-input fast path) must agree too.
    y_fast = jax.block_until_ready(complex_relu(x))
    _check(x_re, x_im, y_fast)

    # --- Ragged case: numel = 105 (not lane-aligned) -> exercises the pad/unpad path.
    k_re, k_im, key = jax.random.split(key, 3)
    shape_ragged = (3, 5, 7)
    r_re = jax.random.normal(k_re, shape_ragged, dtype=jnp.float32)
    r_im = jax.random.normal(k_im, shape_ragged, dtype=jnp.float32)
    xr = jax.lax.complex(r_re, r_im)
    yr = jax.block_until_ready(complex_relu(xr, force_pallas=True))
    _check(r_re, r_im, yr)

    # --- Ragged last grid block: numel = 3072 -> rows = 24, tile = 16 ->
    # 2 blocks, last block masked (locks in the elementwise OOB-safety assumption).
    k_re, k_im, key = jax.random.split(key, 3)
    shape_partial = (3, 32, 32)
    p_re = jax.random.normal(k_re, shape_partial, dtype=jnp.float32)
    p_im = jax.random.normal(k_im, shape_partial, dtype=jnp.float32)
    xp = jax.lax.complex(p_re, p_im)
    yp = jax.block_until_ready(complex_relu(xp, force_pallas=True))
    _check(p_re, p_im, yp)

    print("KERNEL_OK")
</pallas_src>

<mosaic_0001>
module attributes {stable_mosaic.version = 11 : i64} {
  func.func @_relu_kernel(%arg0: i32, %arg1: memref<8x128xf32, #tpu.memory_space<vmem>>, %arg2: memref<8x128xf32, #tpu.memory_space<vmem>>) attributes {dimension_semantics = [#tpu.dimension_semantics<parallel>], iteration_bounds = array<i64: 2>, scalar_prefetch = 0 : i64, scratch_operands = 0 : i64, tpu.core_type = #tpu.core_type<tc>, window_params = [{transform_indices = @transform_0, window_bounds = array<i64: 8, 128>}, {transform_indices = @transform_1, window_bounds = array<i64: 8, 128>}]} {
    %c0 = arith.constant 0 : index
    %c0_0 = arith.constant 0 : index
    %0 = vector.load %arg1[%c0, %c0_0] : memref<8x128xf32, #tpu.memory_space<vmem>>, vector<8x128xf32>
    %cst = arith.constant 0.000000e+00 : f32
    %1 = vector.broadcast %cst : f32 to vector<8x128xf32>
    %2 = arith.maximumf %0, %1 : vector<8x128xf32>
    %c0_1 = arith.constant 0 : index
    %c0_2 = arith.constant 0 : index
    %3 = vector.load %arg2[%c0_1, %c0_2] : memref<8x128xf32, #tpu.memory_space<vmem>>, vector<8x128xf32>
    tpu.vector_store %arg2[%c0_1, %c0_2], %2 {strides = array<i32>} : memref<8x128xf32, #tpu.memory_space<vmem>>, vector<8x128xf32>,
    return
  }
  func.func @transform_0(%arg0: i32) -> (i32, i32) {
    %c0_i32 = arith.constant 0 : i32
    %c0_i32_0 = arith.constant 0 : i32
    return %arg0, %c0_i32 : i32, i32
  }
  func.func @transform_1(%arg0: i32) -> (i32, i32) {
    %c0_i32 = arith.constant 0 : i32
    %c0_i32_0 = arith.constant 0 : i32
    return %arg0, %c0_i32 : i32, i32
  }
}

</mosaic_0001>

<bundles_post_ra>
// kernel: tpu_custom_call.1
= control target key start
LH: loop header
LB: loop body
LE: loop exit
PB: predicated region body
PF: predicated region fallthrough
CT: control target
= control target key end

     0   :  { %6 = vsyncpa [#allocation3], 0  ;;  %s516_s0 = inlined_call_operand.hbm [shape: f32[16,128], index: 0, kind: input, shape index: {}]   ;;  %s517_s1 = inlined_call_operand.hbm [shape: f32[16,128], index: 1, kind: output, shape index: {}]  }
   0x1   :  { %8 = vsyncpa [#allocation3 + $0x1], 0 }
   0x2   :  { %9 = vsyncpa [#allocation4], 0 }
   0x3   :  { %11 = vsyncpa [#allocation4 + $0x1], 0  ;;  %s389_s6 = smov 0   ;;  %s391_s7 = smov 0  }
   0x4   :  { %s393_s8 = smov 0   ;;  %s395_s9 = smov 0  }
   0x5 LB: > { %s410_s10 = sadd.s32 4294967295, %s377_s9   ;;  %s223_s11 = sadd.s32 4294967294, %s377_s9   ;;  %s377_s9 = sphi %s395_s9, %s527_s9   ;;  %s373_s8 = sphi %s393_s8, %s526_s8   ;;  %s369_s7 = sphi %s391_s7, %s525_s7   ;;  %s365_s6 = sphi %s389_s6, %s524_s6  }
   0x6   : > { %s414_s12 = sadd.s32 1, %s377_s9   ;;  %s24_s13 = sadd.s32 1, %s373_s8 }
   0x7   : > { %s21_s14 = ssub.s32 %s377_s9, %s414_s12  ;;  %p31_p0 = scmp.ne.s32.totalorder %s373_s8, %s369_s7 }
   0x8   : > { %p22_p1 = scmp.eq.s32.totalorder %s21_s14, 0  ;;  %p32_p2 = scmp.eq.s32.totalorder %s377_s9, 0 }
   0x9   : > { %p37_p3 = scmp.ne.s32.totalorder %s369_s7, %s365_s6  ;;  %p38_p4 = scmp.eq.s32.totalorder %s410_s10, 0 }
   0xa   : > { %s426_s15 = scalar_select %p22_p1, %s373_s8, %s24_s13  }
   0xb   : > { %p428_p5 = por %p32_p2, %p31_p0  ;;  %p432_p6 = por %p38_p4, %p37_p3 }
   0xc   : > { %p61_p7 = scmp.eq.s32.totalorder %s410_s10, 1  ;;  %p67_p8 = scmp.eq.s32.totalorder %s223_s11, 1 }
   0xd   : > { %p247_p10 = scmp.lt.s32.totalorder %s377_s9, 2  ;;  %s87_s20 = sand.u32 1, %s373_s8  }
   0xe   : > { %p439_p11 = por %p61_p7, %p31_p0  ;;  %p443_p12 = por %p67_p8, %p37_p3 }
   0xf   : > { %s227_s21 = sshll.u32 %s377_s9, 3  ;;  %s226_s22 = sshll.u32 %s87_s20, 3 }
  0x10   : > { %s95_s25 = scalar_lea.hbm %s516_s0, %s227_s21  ;;  %s91_s27 = scalar_lea.vmem [#allocation2], %s226_s22 }
  0x11   : > { %s97_s26 = sshll.u32 %s95_s25, 4  ;;  %s99_s28 = sshll.u32 %s91_s27, 4  ;;  %s98_s26 = int_to_ptr.hbm [resolvable:$true] %s97_s26  ;;  %s100_s28 = int_to_ptr.vmem [resolvable:$true] %s99_s28 }
  0x12   : > { %p454_p13 = pnand %p247_p10, %p428_p5  ;;  %p228_p0 = scmp.ge.s32.totalorder %s377_s9, 1 }
  0x13   : > { %p104_p1 = scmp.lt.s32.totalorder %s377_s9, 3  ;;  %s88_s30 = scalar_lea.sflag [#allocation3], %s87_s20 }
  0x14   : > { %s281_s2 = sshra.s32 %s98_s26, 4  ;;  %p285_p3 = pneg %p454_p13  ;;  %s282_s2 = int_to_ptr.hbm [resolvable:$true] %s281_s2 }
  0x15   : > { %s283_s3 = scalar_lea.hbm %s282_s2, 8  ;;  %s288_s11 = scalar_lea.hbm %s516_s0, 16 }
  0x16   : > { %p284_p2 = scmp.ne.s32.totalorder %s282_s2, %s283_s3  ;;  %p289_p5 = scmp.lt.s32.totalorder %s282_s2, %s516_s0 }
  0x17   : > { %p290_p8 = scmp.lt.s32.totalorder %s288_s11, %s283_s3 }
  0x18   : > { %p286_p4 = pnand %p285_p3, %p284_p2 }
  0x19   : > { %p291_p10 = por %p290_p8, %p289_p5 }
  0x1a   : > { %p287_p7 = pneg %p286_p4 }
  0x1c   : > { %p292_p9 = pnand %p291_p10, %p287_p7 }
  0x1e   : > { %295 = shalt.err (!%p292_p9)
}
  0x1f   : > { %242 = dma.hbm_to_vmem [thread:$0]  (!%p454_p13), %s98_s26, 128, %s100_s28, %s88_s30  }
  0x20   : > { %p105_p2 = pnand %p228_p0, %p104_p1 }
  0x21   : > { %s475_s16 = sand.u32 (!%p105_p2), 1, %s369_s7  }
  0x22   : > { %108 = sbr.rel (%p105_p2) target bundleno = 55 (0x37), region = 24  ;;  %s229_s20 = sshll.u32 (!%p105_p2), %s475_s16, 3 }
  0x23   : > { %s111_s21 = scalar_lea.sflag (!%p105_p2), [#allocation3], %s475_s16  ;;  %s114_s22 = scalar_lea.vmem (!%p105_p2), [#allocation2], %s229_s20 }
  0x27   : > { %356 = dma.done.wait (%p432_p6), %s111_s21, 128  }
  0x28   : > { %358 = vsyncadd (%p432_p6), %s111_s21, 4294967168  ;;  %s232_s23 = sshll.u32 %s410_s10, 3  ;;  %s133_s27 = scalar_lea.vmem [#allocation5], %s229_s20  ;;  %v134_v0 = vld [vmem:[%s114_s22] sm:$0xff] }
  0x29   : > { %s148_s26 = scalar_lea.hbm %s517_s1, %s232_s23  ;;  %s150_s28 = sshll.u32 %s133_s27, 4  ;;  %v135_v1 = vmax.f32 %v134_v0, 0.0  ;;  %s151_s28 = int_to_ptr.vmem [resolvable:$true] %s150_s28 }
  0x2a   : > { %s152_s29 = sshll.u32 %s148_s26, 4  ;;  %s138_s30 = scalar_lea.sflag [#allocation4], %s475_s16  ;;  %s153_s29 = int_to_ptr.hbm [resolvable:$true] %s152_s29 }
  0x2b   : > { %136 = vst [vmem:[%s133_s27] sm:$0xff] %v135_v1  ;;  %s325_s2 = sshra.s32 %s153_s29, 4  ;;  %s331_s4 = scalar_lea.hbm %s517_s1, 16  ;;  %s326_s2 = int_to_ptr.hbm [resolvable:$true] %s325_s2 }
  0x2c   : > { %s327_s17 = scalar_lea.hbm %s326_s2, 8  ;;  %p332_p0 = scmp.lt.s32.totalorder %s326_s2, %s517_s1 }
  0x2d   : > { %p328_p6 = scmp.ne.s32.totalorder %s326_s2, %s327_s17  ;;  %p333_p1 = scmp.lt.s32.totalorder %s331_s4, %s327_s17 }
  0x2f   : > { %p329_p9 = pnand %p328_p6, %p439_p11  ;;  %p334_p3 = por %p333_p1, %p332_p0 }
  0x31   : > { %p330_p13 = pneg %p329_p9 }
  0x33   : > { %p335_p4 = pnand %p334_p3, %p330_p13 }
  0x35   : > { %338 = shalt.err (!%p335_p4)
}
  0x36   : > { %237 = dma.vmem_to_hbm [thread:$0]  (%p439_p11), %s151_s28, 128, %s153_s29, %s138_s30  }
  0x37 PF: > { %s164_s13 = sand.u32 1, %s365_s6   ;;  %p523_p7 = scmp.ge.s32.totalorder %s377_s9, 2 }
  0x38   : > { %s165_s14 = scalar_lea.sflag [#allocation4], %s164_s13 }
  0x39   : > { %p244_p5 = pnand %p523_p7, %p443_p12 }
  0x3b   : > { %p245_p8 = pneg %p244_p5 }
  0x3d   : > { %360 = dma.done.wait (%p245_p8), %s165_s14, 128  }
  0x3e   : > { %362 = vsyncadd (%p245_p8), %s165_s14, 4294967168  ;;  %p14_p10 = scmp.ge.s32.totalorder %s414_s12, 4   ;;  %s524_s6 = smov %s369_s7 }
  0x3f   : > { %s525_s7 = smov %s373_s8  ;;  %s526_s8 = smov %s426_s15 }
  0x40   : > { %s527_s9 = smov %s414_s12  ;;  %16 = sbr.rel (!%p14_p10) target bundleno = 5 (0x5), region = 69 }
  0x45   :  { %171 = vsyncpa [#allocation3], 1 }
  0x46   :  { %173 = vsyncpa [#allocation3 + $0x1], 1 }
  0x47   :  { %174 = vsyncpa [#allocation4], 1 }
  0x48   :  { %176 = vsyncpa [#allocation4 + $0x1], 1 }

</bundles_post_ra>
